<compile_context>
chip_gen: v7x
topology: tpu7x:2x2x1
jax: 0.10.0
libtpu: 0.0.40
codegen_flags: <defaults>
</compile_context>

<pallas_src>
import jax
import jax.numpy as jnp
from jax.experimental import pallas as pl
from jax.experimental.pallas import tpu as pltpu


def _round_up(n, m):
    return ((n + m - 1) // m) * m


def _correlator_kernel(x_ref,
                       w1_ref, b1_ref,
                       w2_ref, b2_ref,
                       w3_ref, b3_ref,
                       w4_ref, b4_ref,
                       o_ref):
    # Layer 1: Linear(L -> 128) + ReLU. f32 operands (K = L is tiny; the
    # kernel is HBM-bound, so the MXU cost of f32 here is irrelevant and it
    # keeps layer-1 accuracy full-precision).
    h = jnp.dot(x_ref[...], w1_ref[...], preferred_element_type=jnp.float32)
    h = jnp.maximum(h + b1_ref[...], 0.0).astype(jnp.bfloat16)

    # Layer 2: Linear(128 -> 64) + ReLU (bf16 MXU operands, f32 accumulate).
    h = jnp.dot(h, w2_ref[...], preferred_element_type=jnp.float32)
    h = jnp.maximum(h + b2_ref[...], 0.0).astype(jnp.bfloat16)

    # Layer 3: Linear(64 -> 128) + ReLU.
    h = jnp.dot(h, w3_ref[...], preferred_element_type=jnp.float32)
    h = jnp.maximum(h + b3_ref[...], 0.0).astype(jnp.bfloat16)

    # Layer 4: Linear(128 -> L) + Softmax over the L real columns only.
    logits = jnp.dot(h, w4_ref[...], preferred_element_type=jnp.float32)
    logits = logits + b4_ref[...]
    m = jnp.max(logits, axis=-1, keepdims=True)
    e = jnp.exp(logits - m)
    denom = jnp.sum(e, axis=-1, keepdims=True)
    # Exact divide (not approx reciprocal): rows sum to 1 to f32 precision,
    # and the VPU/EUP are nowhere near the bottleneck.
    o_ref[...] = (e / denom).astype(o_ref.dtype)


def prepare_params(params):
    """One-time parameter prep (hoisted out of the per-call path).

    Weights are (in_features, out_features).  Layer-1 stays f32; layers 2-4
    use bf16 matmul operands (f32 accumulation in-kernel).  Biases stay f32.
    """
    return {
        "w1": params["w1"].astype(jnp.float32),   # (L, 128)
        "b1": params["b1"].astype(jnp.float32),   # (1, 128)
        "w2": params["w2"].astype(jnp.bfloat16),  # (128, 64)
        "b2": params["b2"].astype(jnp.float32),   # (1, 64)
        "w3": params["w3"].astype(jnp.bfloat16),  # (64, 128)
        "b3": params["b3"].astype(jnp.float32),   # (1, 128)
        "w4": params["w4"].astype(jnp.bfloat16),  # (128, L)
        "b4": params["b4"].astype(jnp.float32),   # (1, L)
    }


def correlator_forward(x, prepared, *, batch_tile=None, out_dtype=jnp.float32):
    """x: (B, num_labels) float32. prepared: output of prepare_params()."""
    B, L = x.shape

    if batch_tile is None:
        # Target >=2 grid steps (v7x megacore sharding) and <=2048 rows per
        # tile (amortizes ~0.35us/step overhead; footprint stays a few MiB,
        # far under scoped VMEM on every generation).
        per_core = _round_up(pl.cdiv(B, 2), 8)
        batch_tile = max(8, min(2048, per_core))
    batch_tile = _round_up(batch_tile, 8)
    Bp = _round_up(B, batch_tile)

    # Only pad the batch dim (by < batch_tile rows) when needed; the feature
    # dim stays at its natural width L.
    xp = x if Bp == B else jnp.pad(x, ((0, Bp - B), (0, 0)))

    w1, b1 = prepared["w1"], prepared["b1"]
    w2, b2 = prepared["w2"], prepared["b2"]
    w3, b3 = prepared["w3"], prepared["b3"]
    w4, b4 = prepared["w4"], prepared["b4"]

    grid = (Bp // batch_tile,)

    # Weights/biases: constant block index -> fetched once, resident in VMEM.
    def const_spec(shape):
        return pl.BlockSpec(shape, lambda i: (0, 0))

    x_spec = pl.BlockSpec((batch_tile, L), lambda i: (i, 0))
    o_spec = pl.BlockSpec((batch_tile, L), lambda i: (i, 0))

    flops = 2 * Bp * (L * 128 + 128 * 64 + 64 * 128 + 128 * L)
    bytes_accessed = (
        Bp * L * 4                                  # x (f32 in)
        + Bp * L * jnp.dtype(out_dtype).itemsize    # probabilities out
        + sum(int(w.size) * w.dtype.itemsize for w in (w1, w2, w3, w4))
        + sum(int(b.size) * b.dtype.itemsize for b in (b1, b2, b3, b4)))
    cost = pl.CostEstimate(flops=flops,
                           transcendentals=Bp * L,
                           bytes_accessed=bytes_accessed)

    out = pl.pallas_call(
        _correlator_kernel,
        out_shape=jax.ShapeDtypeStruct((Bp, L), out_dtype),
        grid_spec=pltpu.PrefetchScalarGridSpec(
            num_scalar_prefetch=0,
            grid=grid,
            in_specs=[
                x_spec,
                const_spec(w1.shape), const_spec(b1.shape),
                const_spec(w2.shape), const_spec(b2.shape),
                const_spec(w3.shape), const_spec(b3.shape),
                const_spec(w4.shape), const_spec(b4.shape),
            ],
            out_specs=o_spec,
        ),
        compiler_params=pltpu.CompilerParams(
            dimension_semantics=("parallel",),
            vmem_limit_bytes=32 * 1024 * 1024),
        cost_estimate=cost,
    )(xp, w1, b1, w2, b2, w3, b3, w4, b4)

    return out if Bp == B else out[:B]


def init_correlator_params(num_labels, key):
    """Deterministic PyTorch-style (uniform(-1/sqrt(fan_in), ...)) init.

    Weights are stored transposed, i.e. (in_features, out_features), in f32."""
    dims = [(num_labels, 128), (128, 64), (64, 128), (128, num_labels)]
    params = {}
    for idx, (fan_in, fan_out) in enumerate(dims, start=1):
        key, kw, kb = jax.random.split(key, 3)
        bound = 1.0 / jnp.sqrt(jnp.float32(fan_in))
        params[f"w{idx}"] = jax.random.uniform(
            kw, (fan_in, fan_out), jnp.float32, -bound, bound)
        params[f"b{idx}"] = jax.random.uniform(
            kb, (1, fan_out), jnp.float32, -bound, bound)
    return params


def correlator_ref(x, params):
    """Pure-JAX f32 reference for correctness checking."""
    h = jax.nn.relu(x @ params["w1"] + params["b1"])
    h = jax.nn.relu(h @ params["w2"] + params["b2"])
    h = jax.nn.relu(h @ params["w3"] + params["b3"])
    logits = h @ params["w4"] + params["b4"]
    return jax.nn.softmax(logits, axis=-1)


if __name__ == "__main__":
    num_labels = 16
    batch = 8

    key = jax.random.PRNGKey(0)
    key, kx = jax.random.split(key)
    x = jax.random.normal(kx, (batch, num_labels), jnp.float32)
    params = init_correlator_params(num_labels, key)
    prepared = prepare_params(params)   # one-time prep, reused across calls

    out = correlator_forward(x, prepared)
    out = jax.block_until_ready(out)

    ref = correlator_ref(x, params)
    assert out.shape == (batch, num_labels)
    # bf16 MXU operands in layers 2-4 -> loosened tolerance vs f32 reference.
    assert jnp.allclose(out, ref, atol=2e-2, rtol=2e-2), "mismatch vs reference"
    # exact divide -> rows of the softmax sum to 1 to f32 precision
    assert jnp.allclose(jnp.sum(out, axis=-1), 1.0, atol=1e-3)

    print("KERNEL_OK")
</pallas_src>

<mosaic_0001>
module attributes {stable_mosaic.version = 11 : i64} {
  func.func @_correlator_kernel(%arg0: i32, %arg1: memref<8x16xf32, #tpu.memory_space<vmem>>, %arg2: memref<16x128xf32, #tpu.memory_space<vmem>>, %arg3: memref<1x128xf32, #tpu.memory_space<vmem>>, %arg4: memref<128x64xbf16, #tpu.memory_space<vmem>>, %arg5: memref<1x64xf32, #tpu.memory_space<vmem>>, %arg6: memref<64x128xbf16, #tpu.memory_space<vmem>>, %arg7: memref<1x128xf32, #tpu.memory_space<vmem>>, %arg8: memref<128x16xbf16, #tpu.memory_space<vmem>>, %arg9: memref<1x16xf32, #tpu.memory_space<vmem>>, %arg10: memref<8x16xf32, #tpu.memory_space<vmem>>) attributes {dimension_semantics = [#tpu.dimension_semantics<parallel>], iteration_bounds = array<i64: 1>, scalar_prefetch = 0 : i64, scratch_operands = 0 : i64, tpu.core_type = #tpu.core_type<tc>, window_params = [{transform_indices = @transform_0, window_bounds = array<i64: 8, 16>}, {pipeline_mode = #tpu.pipeline_mode<synchronous>, transform_indices = @transform_1, window_bounds = array<i64: 16, 128>}, {pipeline_mode = #tpu.pipeline_mode<synchronous>, transform_indices = @transform_2, window_bounds = array<i64: 1, 128>}, {pipeline_mode = #tpu.pipeline_mode<synchronous>, transform_indices = @transform_3, window_bounds = array<i64: 128, 64>}, {pipeline_mode = #tpu.pipeline_mode<synchronous>, transform_indices = @transform_4, window_bounds = array<i64: 1, 64>}, {pipeline_mode = #tpu.pipeline_mode<synchronous>, transform_indices = @transform_5, window_bounds = array<i64: 64, 128>}, {pipeline_mode = #tpu.pipeline_mode<synchronous>, transform_indices = @transform_6, window_bounds = array<i64: 1, 128>}, {pipeline_mode = #tpu.pipeline_mode<synchronous>, transform_indices = @transform_7, window_bounds = array<i64: 128, 16>}, {pipeline_mode = #tpu.pipeline_mode<synchronous>, transform_indices = @transform_8, window_bounds = array<i64: 1, 16>}, {transform_indices = @transform_9, window_bounds = array<i64: 8, 16>}]} {
    %c0 = arith.constant 0 : index
    %c0_0 = arith.constant 0 : index
    %0 = vector.load %arg1[%c0, %c0_0] : memref<8x16xf32, #tpu.memory_space<vmem>>, vector<8x16xf32>
    %c0_1 = arith.constant 0 : index
    %c0_2 = arith.constant 0 : index
    %1 = vector.load %arg2[%c0_1, %c0_2] : memref<16x128xf32, #tpu.memory_space<vmem>>, vector<16x128xf32>
    %cst = arith.constant dense<0.000000e+00> : vector<8x128xf32>
    %2 = tpu.matmul %0, %1, %cst {dimension_numbers = #tpu.dot_dimension_numbers<[1], [0], [0], [1], [0, 0, 1, 1], [], []>} : vector<8x16xf32>, vector<16x128xf32>, vector<8x128xf32> -> vector<8x128xf32>
    %c0_3 = arith.constant 0 : index
    %c0_4 = arith.constant 0 : index
    %3 = vector.load %arg3[%c0_3, %c0_4] : memref<1x128xf32, #tpu.memory_space<vmem>>, vector<1x128xf32>
    %4 = vector.broadcast %3 : vector<1x128xf32> to vector<8x128xf32>
    %5 = arith.addf %2, %4 : vector<8x128xf32>
    %cst_5 = arith.constant 0.000000e+00 : f32
    %6 = vector.broadcast %cst_5 : f32 to vector<8x128xf32>
    %7 = arith.maximumf %5, %6 : vector<8x128xf32>
    %8 = arith.truncf %7 : vector<8x128xf32> to vector<8x128xbf16>
    %c0_6 = arith.constant 0 : index
    %c0_7 = arith.constant 0 : index
    %9 = vector.load %arg4[%c0_6, %c0_7] : memref<128x64xbf16, #tpu.memory_space<vmem>>, vector<128x64xbf16>
    %cst_8 = arith.constant dense<0.000000e+00> : vector<8x64xf32>
    %10 = tpu.matmul %8, %9, %cst_8 {dimension_numbers = #tpu.dot_dimension_numbers<[1], [0], [0], [1], [0, 0, 1, 1], [], []>} : vector<8x128xbf16>, vector<128x64xbf16>, vector<8x64xf32> -> vector<8x64xf32>
    %c0_9 = arith.constant 0 : index
    %c0_10 = arith.constant 0 : index
    %11 = vector.load %arg5[%c0_9, %c0_10] : memref<1x64xf32, #tpu.memory_space<vmem>>, vector<1x64xf32>
    %12 = vector.broadcast %11 : vector<1x64xf32> to vector<8x64xf32>
    %13 = arith.addf %10, %12 : vector<8x64xf32>
    %cst_11 = arith.constant 0.000000e+00 : f32
    %14 = vector.broadcast %cst_11 : f32 to vector<8x64xf32>
    %15 = arith.maximumf %13, %14 : vector<8x64xf32>
    %16 = arith.truncf %15 : vector<8x64xf32> to vector<8x64xbf16>
    %c0_12 = arith.constant 0 : index
    %c0_13 = arith.constant 0 : index
    %17 = vector.load %arg6[%c0_12, %c0_13] : memref<64x128xbf16, #tpu.memory_space<vmem>>, vector<64x128xbf16>
    %cst_14 = arith.constant dense<0.000000e+00> : vector<8x128xf32>
    %18 = tpu.matmul %16, %17, %cst_14 {dimension_numbers = #tpu.dot_dimension_numbers<[1], [0], [0], [1], [0, 0, 1, 1], [], []>} : vector<8x64xbf16>, vector<64x128xbf16>, vector<8x128xf32> -> vector<8x128xf32>
    %c0_15 = arith.constant 0 : index
    %c0_16 = arith.constant 0 : index
    %19 = vector.load %arg7[%c0_15, %c0_16] : memref<1x128xf32, #tpu.memory_space<vmem>>, vector<1x128xf32>
    %20 = vector.broadcast %19 : vector<1x128xf32> to vector<8x128xf32>
    %21 = arith.addf %18, %20 : vector<8x128xf32>
    %cst_17 = arith.constant 0.000000e+00 : f32
    %22 = vector.broadcast %cst_17 : f32 to vector<8x128xf32>
    %23 = arith.maximumf %21, %22 : vector<8x128xf32>
    %24 = arith.truncf %23 : vector<8x128xf32> to vector<8x128xbf16>
    %c0_18 = arith.constant 0 : index
    %c0_19 = arith.constant 0 : index
    %25 = vector.load %arg8[%c0_18, %c0_19] : memref<128x16xbf16, #tpu.memory_space<vmem>>, vector<128x16xbf16>
    %cst_20 = arith.constant dense<0.000000e+00> : vector<8x16xf32>
    %26 = tpu.matmul %24, %25, %cst_20 {dimension_numbers = #tpu.dot_dimension_numbers<[1], [0], [0], [1], [0, 0, 1, 1], [], []>} : vector<8x128xbf16>, vector<128x16xbf16>, vector<8x16xf32> -> vector<8x16xf32>
    %c0_21 = arith.constant 0 : index
    %c0_22 = arith.constant 0 : index
    %27 = vector.load %arg9[%c0_21, %c0_22] : memref<1x16xf32, #tpu.memory_space<vmem>>, vector<1x16xf32>
    %28 = vector.broadcast %27 : vector<1x16xf32> to vector<8x16xf32>
    %29 = arith.addf %26, %28 : vector<8x16xf32>
    %cst_23 = arith.constant dense<0xFF800000> : vector<8xf32>
    %30 = vector.multi_reduction <maximumf>, %29, %cst_23 [1] : vector<8x16xf32> to vector<8xf32>
    %31 = vector.shape_cast %30 : vector<8xf32> to vector<8x1xf32>
    %32 = vector.broadcast %31 : vector<8x1xf32> to vector<8x16xf32>
    %33 = arith.subf %29, %32 : vector<8x16xf32>
    %34 = math.exp %33 : vector<8x16xf32>
    %cst_24 = arith.constant dense<0.000000e+00> : vector<8xf32>
    %35 = vector.multi_reduction <add>, %34, %cst_24 [1] : vector<8x16xf32> to vector<8xf32>
    %36 = vector.shape_cast %35 : vector<8xf32> to vector<8x1xf32>
    %37 = vector.broadcast %36 : vector<8x1xf32> to vector<8x16xf32>
    %38 = arith.divf %34, %37 : vector<8x16xf32>
    %c0_25 = arith.constant 0 : index
    %c0_26 = arith.constant 0 : index
    %39 = vector.load %arg10[%c0_25, %c0_26] : memref<8x16xf32, #tpu.memory_space<vmem>>, vector<8x16xf32>
    tpu.vector_store %arg10[%c0_25, %c0_26], %38 {strides = array<i32>} : memref<8x16xf32, #tpu.memory_space<vmem>>, vector<8x16xf32>,
    return
  }
  func.func @transform_0(%arg0: i32) -> (i32, i32) {
    %c0_i32 = arith.constant 0 : i32
    %c0_i32_0 = arith.constant 0 : i32
    return %arg0, %c0_i32 : i32, i32
  }
  func.func @transform_1(%arg0: i32) -> (i32, i32) {
    %c0_i32 = arith.constant 0 : i32
    %c0_i32_0 = arith.constant 0 : i32
    %c0_i32_1 = arith.constant 0 : i32
    return %c0_i32, %c0_i32_0 : i32, i32
  }
  func.func @transform_2(%arg0: i32) -> (i32, i32) {
    %c0_i32 = arith.constant 0 : i32
    %c0_i32_0 = arith.constant 0 : i32
    %c0_i32_1 = arith.constant 0 : i32
    return %c0_i32, %c0_i32_0 : i32, i32
  }
  func.func @transform_3(%arg0: i32) -> (i32, i32) {
    %c0_i32 = arith.constant 0 : i32
    %c0_i32_0 = arith.constant 0 : i32
    %c0_i32_1 = arith.constant 0 : i32
    return %c0_i32, %c0_i32_0 : i32, i32
  }
  func.func @transform_4(%arg0: i32) -> (i32, i32) {
    %c0_i32 = arith.constant 0 : i32
    %c0_i32_0 = arith.constant 0 : i32
    %c0_i32_1 = arith.constant 0 : i32
    return %c0_i32, %c0_i32_0 : i32, i32
  }
  func.func @transform_5(%arg0: i32) -> (i32, i32) {
    %c0_i32 = arith.constant 0 : i32
    %c0_i32_0 = arith.constant 0 : i32
    %c0_i32_1 = arith.constant 0 : i32
    return %c0_i32, %c0_i32_0 : i32, i32
  }
  func.func @transform_6(%arg0: i32) -> (i32, i32) {
    %c0_i32 = arith.constant 0 : i32
    %c0_i32_0 = arith.constant 0 : i32
    %c0_i32_1 = arith.constant 0 : i32
    return %c0_i32, %c0_i32_0 : i32, i32
  }
  func.func @transform_7(%arg0: i32) -> (i32, i32) {
    %c0_i32 = arith.constant 0 : i32
    %c0_i32_0 = arith.constant 0 : i32
    %c0_i32_1 = arith.constant 0 : i32
    return %c0_i32, %c0_i32_0 : i32, i32
  }
  func.func @transform_8(%arg0: i32) -> (i32, i32) {
    %c0_i32 = arith.constant 0 : i32
    %c0_i32_0 = arith.constant 0 : i32
    %c0_i32_1 = arith.constant 0 : i32
    return %c0_i32, %c0_i32_0 : i32, i32
  }
  func.func @transform_9(%arg0: i32) -> (i32, i32) {
    %c0_i32 = arith.constant 0 : i32
    %c0_i32_0 = arith.constant 0 : i32
    return %arg0, %c0_i32 : i32, i32
  }
}

</mosaic_0001>

<bundles_post_ra>
// kernel: tpu_custom_call.1
= control target key start
LH: loop header
LB: loop body
LE: loop exit
PB: predicated region body
PF: predicated region fallthrough
CT: control target
= control target key end

     0   :  { %v621_v2 = vmov 0.0|0.0   ;;  %vm622_vm0 = vmmov 0   ;;  %v623_v4 = vmov 0.0   ;;  %vm44_vm1 = vcmask 130048   ;;  %s800_s0 = inlined_call_operand.vmem [shape: f32[8,16], index: 0, kind: input, shape index: {}]   ;;  %s801_s1 = inlined_call_operand.vmem [shape: f32[16,128], index: 1, kind: input, shape index: {}]   ;;  %s802_s2 = inlined_call_operand.vmem [shape: f32[1,128], index: 2, kind: input, shape index: {}]   ;;  %s803_s3 = inlined_call_operand.vmem [shape: bf16[128,64], index: 3, kind: input, shape index: {}]   ;;  %s804_s4 = inlined_call_operand.vmem [shape: f32[1,64], index: 4, kind: input, shape index: {}]   ;;  %s805_s5 = inlined_call_operand.vmem [shape: bf16[64,128], index: 5, kind: input, shape index: {}]   ;;  %s806_s6 = inlined_call_operand.vmem [shape: f32[1,128], index: 6, kind: input, shape index: {}]   ;;  %s807_s7 = inlined_call_operand.vmem [shape: bf16[128,16], index: 7, kind: input, shape index: {}]   ;;  %s808_s8 = inlined_call_operand.vmem [shape: f32[1,16], index: 8, kind: input, shape index: {}]   ;;  %s809_s9 = inlined_call_operand.hbm [shape: f32[8,16], index: 9, kind: output, shape index: {}]  }
   0x1   :  { %v35_v0 = vld [vmem:[%s801_s1] sm:$0xff]  ;;  %v36_v1 = vld [vmem:[%s801_s1 + $0x8] sm:$0xff]  ;;  %566 = vmatprep.subr.bf16.mxu1 %v621_v2  ;;  %511 = vmatprep.mubr.msk.f32.mxu1 %vm622_vm0, %v623_v4  ;;  %v575_v8 = vld [vmem:[%s803_s3 + $0x10] sm:$0xff]  }
   0x2   :  { %v567_v3 = vpack.c.bf16 %v36_v1, %v35_v0  ;;  %v34_v5 = vld [vmem:[%s800_s0] sm:$0xff]  ;;  %534 = vmatprep.subr.bf16.mxu0 %v623_v4  ;;  %542 = vmatprep.mubr.msk.bf16.mxu0 %vm622_vm0, %v623_v4  ;;  %v574_v7 = vld [vmem:[%s803_s3 + $0x8] sm:$0xff]   ;;  %v576_v9 = vld [vmem:[%s803_s3 + $0x18] sm:$0xff]  }
   0x3   :  { %v573_v6 = vld [vmem:[%s803_s3] sm:$0xff]  }
   0x4   :  { %568 = vmatpush3.bf16.msra.mxu1 %v567_v3 }
   0x5   :  { %514 = vmatprep.subr.bf16.mxu1 %v623_v4 }
   0x7   :  { %512 = vmatmul.mubr.msk.f32.vlgmr.msra.gmra.mrb[0].mxu1 %vm44_vm1, %v34_v5 }
   0x8   :  { %515 = vmatpush3.bf16.msra.mxu1 %v573_v6  ;;  %530 = vmatprep.mubr.msk.bf16.mxu1 %vm622_vm0, %v623_v4 }
   0x9   :  { %516 = vmatprep.subr.bf16.mxu1 %v623_v4 }
   0xc   :  { %517 = vmatpush3.bf16.msra.mxu1 %v574_v7 }
   0xd   :  { %518 = vmatprep.subr.bf16.mxu1 %v623_v4 }
  0x10   :  { %519 = vmatpush3.bf16.msra.mxu1 %v575_v8 }
  0x11   :  { %520 = vmatprep.subr.bf16.mxu1 %v623_v4 }
  0x12   :  { %14 = vsyncpa [#allocation3], 0  ;;  %v577_v10 = vld [vmem:[%s803_s3 + $0x20] sm:$0xff]   ;;  %v578_v11 = vld [vmem:[%s803_s3 + $0x28] sm:$0xff]   ;;  %vm272_vm2 = vcmask 523264  }
  0x13   :  { %v579_v12 = vld [vmem:[%s803_s3 + $0x30] sm:$0xff]   ;;  %v580_v13 = vld [vmem:[%s803_s3 + $0x38] sm:$0xff]   ;;  %v581_v14 = vld [vmem:[%s805_s5] sm:$0xff]  }
  0x14   :  { %521 = vmatpush3.bf16.msra.mxu1 %v576_v9  ;;  %535 = vmatpush3.bf16.msra.mxu0 %v581_v14  ;;  %v582_v15 = vld [vmem:[%s805_s5 + $0x8] sm:$0xff]   ;;  %v455_v16 = vld [vmem:[%s802_s2] ss:$0 sm:$0xff]  ;;  %v583_v22 = vld [vmem:[%s805_s5 + $0x10] sm:$0xff]  }
  0x15   :  { %522 = vmatprep.subr.bf16.mxu1 %v623_v4  ;;  %536 = vmatprep.subr.bf16.mxu0 %v623_v4  ;;  %v584_v23 = vld [vmem:[%s805_s5 + $0x18] sm:$0xff]   ;;  %v457_v24 = vld [vmem:[%s804_s4] ss:$0 sm:$0xff]  ;;  %v586_v33 = vld [vmem:[%s807_s7 + $0x8] sm:$0xff]  }
  0x16   :  { %v585_v31 = vld [vmem:[%s807_s7] sm:$0xff]   ;;  %v587_v34 = vld [vmem:[%s807_s7 + $0x10] sm:$0xff]   ;;  %v588_v35 = vld [vmem:[%s807_s7 + $0x18] sm:$0xff]  }
  0x17   :  { %v589_v36 = vld [vmem:[%s807_s7 + $0x20] sm:$0xff]   ;;  %v590_v37 = vld [vmem:[%s807_s7 + $0x28] sm:$0xff]   ;;  %v591_v38 = vld [vmem:[%s807_s7 + $0x30] sm:$0xff]  }
  0x18   :  { %523 = vmatpush3.bf16.msra.mxu1 %v577_v10  ;;  %537 = vmatpush3.bf16.msra.mxu0 %v582_v15  ;;  %v592_v39 = vld [vmem:[%s807_s7 + $0x38] sm:$0xff]   ;;  %v466_v40 = vld [vmem:[%s806_s6] ss:$0 sm:$0xff]  ;;  %s624_s6 = smov [#allocation2]  }
  0x19   :  { %524 = vmatprep.subr.bf16.mxu1 %v623_v4  ;;  %538 = vmatprep.subr.bf16.mxu0 %v623_v4  ;;  %v472_v48 = vld [vmem:[%s808_s8] ss:$0 sm:$0xff]  ;;  %s447_s7 = sshll.u32 %s624_s6, 4  ;;  %s448_s7 = int_to_ptr.vmem [resolvable:$true] %s447_s7 }
  0x1a   :  { %s597_s8 = scalar_lea.vmem %s448_s7, 128  ;;  %p602_p1 = scmp.lt.s32.totalorder %s448_s7, %s448_s7 }
  0x1b   :  { %p598_p0 = scmp.ne.s32.totalorder %s448_s7, %s597_s8  ;;  %p603_p2 = scmp.lt.s32.totalorder %s597_s8, %s597_s8 }
  0x1c   :  { %525 = vmatpush3.bf16.msra.mxu1 %v578_v11  ;;  %539 = vmatpush3.bf16.msra.mxu0 %v583_v22 }
  0x1d   :  { %526 = vmatprep.subr.bf16.mxu1 %v623_v4  ;;  %540 = vmatprep.subr.bf16.mxu0 %v623_v4  ;;  %p604_p3 = por %p603_p2, %p602_p1 }
  0x1f   :  { %p605_p4 = pnand %p604_p3, %p598_p0 }
  0x20   :  { %527 = vmatpush3.bf16.msra.mxu1 %v579_v12  ;;  %541 = vmatpush3.bf16.msra.mxu0 %v584_v23 }
  0x21   :  { %528 = vmatprep.subr.bf16.mxu1 %v623_v4  ;;  %546 = vmatprep.subr.bf16.mxu0 %v623_v4 }
  0x24   :  { %529 = vmatpush3.bf16.msra.mxu1 %v580_v13 }
  0xda   :  { %v114_v17 = vpop.f32.mrb[0].mxu1 }
  0xdb   :  { %v115_v18 = vadd.f32 %v455_v16, %v114_v17  ;;  %v513_v19 = vpop.f32.mrb[1].mxu1 }
  0xdd   :  { %v118_v20 = vmax.f32 %v115_v18, 0.0 }
  0xdf   :  { %v119_v21 = vpack.c.bf16 %v118_v20, %v118_v20 }
  0xe1   :  { %531 = vmatmul.mubr.bf16.vlgmr.msra.gmra.mrb[4].mxu1 %v119_v21 }
 0x1b4   :  { %v225_v25 = vpop.f32.mrb[4].mxu1 }
 0x1b5   :  { %v226_v26 = vadd.f32 %v457_v24, %v225_v25  ;;  %v532_v27 = vpop.f32.mrb[5].mxu1 }
 0x1b6   :  { %v228_v28 = vpop.f32.mrb[6].mxu1 }
 0x1b7   :  { %v231_v29 = vmax.f32 %v226_v26, 0.0  ;;  %v533_v30 = vpop.f32.mrb[7].mxu1 }
 0x1b9   :  { %v232_v32 = vpack.c.bf16 %v231_v29, %v231_v29 }
 0x1bb   :  { %543 = vmatmul.mubr.msk.bf16.vlgmr.msra.gmra.mrb[0].mxu0 %vm272_vm2, %v232_v32 }
 0x1bc   :  { %547 = vmatpush3.bf16.msra.mxu0 %v585_v31  ;;  %562 = vmatprep.mubr.msk.bf16.mxu0 %vm622_vm0, %v623_v4 }
 0x1bd   :  { %548 = vmatprep.subr.bf16.mxu0 %v623_v4 }
 0x1c0   :  { %549 = vmatpush3.bf16.msra.mxu0 %v586_v33 }
 0x1c1   :  { %550 = vmatprep.subr.bf16.mxu0 %v623_v4 }
 0x1c4   :  { %551 = vmatpush3.bf16.msra.mxu0 %v587_v34 }
 0x1c5   :  { %552 = vmatprep.subr.bf16.mxu0 %v623_v4 }
 0x1c8   :  { %553 = vmatpush3.bf16.msra.mxu0 %v588_v35 }
 0x1c9   :  { %554 = vmatprep.subr.bf16.mxu0 %v623_v4 }
 0x1cc   :  { %555 = vmatpush3.bf16.msra.mxu0 %v589_v36 }
 0x1cd   :  { %556 = vmatprep.subr.bf16.mxu0 %v623_v4 }
 0x1d0   :  { %557 = vmatpush3.bf16.msra.mxu0 %v590_v37 }
 0x1d1   :  { %558 = vmatprep.subr.bf16.mxu0 %v623_v4 }
 0x1d4   :  { %559 = vmatpush3.bf16.msra.mxu0 %v591_v38 }
 0x1d5   :  { %560 = vmatprep.subr.bf16.mxu0 %v623_v4 }
 0x1d8   :  { %561 = vmatpush3.bf16.msra.mxu0 %v592_v39 }
 0x28e   :  { %v310_v41 = vpop.f32.mrb[0].mxu0 }
 0x28f   :  { %v311_v42 = vadd.f32 %v466_v40, %v310_v41  ;;  %v544_v43 = vpop.f32.mrb[1].mxu0 }
 0x290   :  { %v313_v44 = vpop.f32.mrb[2].mxu0 }
 0x291   :  { %v316_v45 = vmax.f32 %v311_v42, 0.0  ;;  %v545_v46 = vpop.f32.mrb[3].mxu0 }
 0x293   :  { %v317_v47 = vpack.c.bf16 %v316_v45, %v316_v45 }
 0x295   :  { %563 = vmatmul.mubr.bf16.vlgmr.msra.gmra.mrb[4].mxu0 %v317_v47 }
 0x368   :  { %v423_v49 = vpop.f32.mrb[4].mxu0 }
 0x369   :  { %v424_v50 = vadd.f32 %v472_v48, %v423_v49  ;;  %v564_v51 = vpop.f32.mrb[5].mxu0 }
 0x36a   :  { %v426_v52 = vpop.f32.mrb[6].mxu0 }
 0x36b   :  { %v565_v53 = vpop.f32.mrb[7].mxu0  ;;  %v429_v54 = vsel %vm44_vm1, %v424_v50, -inf }
 0x36c   :  { %430 = vmax.xlane.f32.xlu0 %v429_v54 }
 0x3f9   :  { %v431_v55 = vpop.xlane.xlu0 %430 }
 0x3fa   :  { %v432_v56 = vsub.f32 %v424_v50, %v431_v55 }
 0x3fc   :  { %v433_v57 = vmul.f32 1.442695, %v432_v56 }
 0x3fe   :  { %593 = vpow2.f32 %v433_v57 }
 0x408   :  { %v594_v58 = vpop.eup %593 }
 0x409   :  { %v435_v59 = vsel %vm44_vm1, %v594_v58, 0.0 }
 0x40a   :  { %436 = vadd.xlane.f32.xlu0 %v435_v59 }
 0x497   :  { %v437_v60 = vpop.xlane.xlu0 %436 }
 0x498   :  { %595 = vrcp.f32 %v437_v60 }
 0x4a2   :  { %v596_v61 = vpop.eup %595 }
 0x4a3   :  { %v439_v62 = vmul.f32 %v596_v61, %v594_v58 }
 0x4a5   :  { %440 = vst.msk [vmem:[#allocation2] sm:$0xff] %vm44_vm1, %v439_v62 }
 0x4a6   :  { %608 = shalt.err (!%p605_p4)
}
 0x4a7   :  { %s609_s14 = scalar_lea.hbm %s809_s9, 128 }
 0x4a8   :  { %p610_p5 = scmp.ne.s32.totalorder %s809_s9, %s609_s14  ;;  %p613_p6 = scmp.lt.u32.totalorder %s609_s14, %s809_s9 }
 0x4aa   :  { %p615_p7 = pnand %p613_p6, %p610_p5 }
 0x4ac   :  { %618 = shalt.err (!%p615_p7)
}
 0x4ad   :  { %450 = dma.vmem_to_hbm [thread:$0]  %s448_s7, 128, %s809_s9, [#allocation3]  }
 0x4ae   :  { %619 = dma.done.wait [#allocation3], 128  }
 0x4af   :  { %620 = vsyncadd [#allocation3], 4294967168 }
 0x4b0   :  { %454 = vsyncpa [#allocation3], 1 }

</bundles_post_ra>
